<compile_context>
chip_gen: v5e
topology: v5e:2x2
jax: 0.10.0
libtpu: 0.0.40
codegen_flags: <defaults>
</compile_context>

<pallas_src>
import functools

import jax
import jax.numpy as jnp
from jax.experimental import pallas as pl
from jax.experimental.pallas import tpu as pltpu


def _round_up(x: int, m: int) -> int:
    return ((x + m - 1) // m) * m


def _pick_tile(dim_p: int, cap: int, *, min_blocks: int = 1) -> int:
    """Largest multiple of 128 that divides dim_p (itself a multiple of 128),
    is <= cap, and (when possible) leaves >= min_blocks grid blocks."""
    best = 128
    t = 128
    limit = min(cap, dim_p)
    while t <= limit:
        if dim_p % t == 0 and dim_p // t >= min_blocks:
            best = t
        t += 128
    return best


def _gcn_layer_kernel(adj_ref, x_ref, w_ref, b_ref, o_ref, *, negative_slope):
    """One (i, j, k) step of  out = LeakyReLU(Adj @ (X @ W) + b)."""
    k = pl.program_id(2)

    @pl.when(k == 0)
    def _init():
        o_ref[...] = jnp.zeros_like(o_ref)

    # Feature transform for this k-slab of nodes: (tk, F) @ (F, tn) -> (tk, tn).
    # W's index map is k-invariant, so its (F, tn) slice stays resident in VMEM.
    t = jax.lax.dot_general(
        x_ref[...], w_ref[...],
        dimension_numbers=(((1,), (0,)), ((), ())),
        preferred_element_type=jnp.float32,
    ).astype(adj_ref.dtype)

    # Aggregation: (tm, tk) @ (tk, tn), accumulated straight into the resident
    # f32 output block (its index map is also k-invariant).
    o_ref[...] += jax.lax.dot_general(
        adj_ref[...], t,
        dimension_numbers=(((1,), (0,)), ((), ())),
        preferred_element_type=jnp.float32,
    )

    @pl.when(k == pl.num_programs(2) - 1)
    def _finalize():
        z = o_ref[...] + b_ref[...]            # (1, tn) broadcasts over (tm, tn)
        o_ref[...] = jnp.where(z >= 0.0, z, negative_slope * z)


def gcn_layer(adj_p, x_p, w_p, b_p, *, negative_slope=0.2,
              tm_cap=512, tn_cap=512, tk_cap=512):
    """Fused GCN layer on padded operands: LeakyReLU(Adj @ (X @ W) + b).

    adj_p: (Mp, Mp)   x_p: (Mp, Fp)   w_p: (Fp, Np)   b_p: (1, Np) f32.
    Returns (Mp, Np) float32 (still padded).
    """
    Mp, Kp = adj_p.shape
    Fp = x_p.shape[1]
    Np = w_p.shape[1]

    # >= 2 blocks on the parallel i axis when possible: keeps both v7x TCs busy.
    tm = _pick_tile(Mp, tm_cap, min_blocks=2)
    tn = _pick_tile(Np, tn_cap)
    tk = _pick_tile(Kp, tk_cap)
    grid = (Mp // tm, Np // tn, Kp // tk)

    kernel = functools.partial(_gcn_layer_kernel, negative_slope=negative_slope)

    return pl.pallas_call(
        kernel,
        out_shape=jax.ShapeDtypeStruct((Mp, Np), jnp.float32),
        grid_spec=pltpu.PrefetchScalarGridSpec(
            num_scalar_prefetch=0,
            grid=grid,
            in_specs=[
                pl.BlockSpec((tm, tk), lambda i, j, k: (i, k)),   # Adj tile
                pl.BlockSpec((tk, Fp), lambda i, j, k: (k, 0)),   # X node slab (full F)
                pl.BlockSpec((Fp, tn), lambda i, j, k: (0, j)),   # W slice (VMEM resident)
                pl.BlockSpec((1, tn), lambda i, j, k: (0, j)),    # bias slice
            ],
            out_specs=pl.BlockSpec((tm, tn), lambda i, j, k: (i, j)),
        ),
        compiler_params=pltpu.CompilerParams(
            dimension_semantics=("parallel", "parallel", "arbitrary"),
        ),
    )(adj_p, x_p, w_p, b_p)


def _pad2(a, rows, cols, dtype):
    r, c = a.shape
    return jnp.pad(a.astype(dtype), ((0, rows - r), (0, cols - c)))


def encoder_forward(X, Adj, W1, b1, W2, b2, *, negative_slope=0.2,
                    mxu_dtype=jnp.float32):
    """Encoder.forward: two fused GCN layers with LeakyReLU(0.2).

    mxu_dtype=jnp.bfloat16 halves HBM/VMEM traffic and hits MXU bf16 peak on
    v6e/v7x (accumulation stays f32); f32 is the default for tight tolerances.
    """
    # TODO(synk): GCNConv's edge_index normalization (self-loops + D^-1/2 A D^-1/2)
    # is assumed to be pre-applied to the dense Adj passed in.
    N_nodes, F_in = X.shape
    H1 = W1.shape[1]
    H2 = W2.shape[1]

    # Pad everything ONCE to 128-multiples; intermediates stay padded and only
    # the final Z2 is sliced.  Zero padding keeps the math exact: padded Adj
    # columns are zero (garbage in padded node rows never contaminates real
    # rows) and padded feature rows of W are zero (padded X columns add 0).
    Mp = _round_up(N_nodes, 128)
    Fp = _round_up(F_in, 128)
    H1p = _round_up(H1, 128)
    H2p = _round_up(H2, 128)

    adj_p = _pad2(Adj, Mp, Mp, mxu_dtype)
    x_p = _pad2(X, Mp, Fp, mxu_dtype)
    w1_p = _pad2(W1, Fp, H1p, mxu_dtype)
    w2_p = _pad2(W2, H1p, H2p, mxu_dtype)
    b1_p = _pad2(b1.reshape(1, -1), 1, H1p, jnp.float32)
    b2_p = _pad2(b2.reshape(1, -1), 1, H2p, jnp.float32)

    z1_p = gcn_layer(adj_p, x_p, w1_p, b1_p, negative_slope=negative_slope)
    z1_in = z1_p if z1_p.dtype == mxu_dtype else z1_p.astype(mxu_dtype)
    z2_p = gcn_layer(adj_p, z1_in, w2_p, b2_p, negative_slope=negative_slope)

    return z2_p[:N_nodes, :H2]


if __name__ == "__main__":
    key = jax.random.PRNGKey(0)
    kx, ka, kw1, kb1, kw2, kb2 = jax.random.split(key, 6)

    # small graph: 200 nodes (deliberately NOT a tile multiple), 32 input feats
    N, F_IN, H1, H2 = 200, 32, 64, 16
    X = jax.random.normal(kx, (N, F_IN), dtype=jnp.float32)

    # symmetric 0/1 adjacency with self loops, symmetric-normalized (dense)
    u = jax.random.uniform(ka, (N, N))
    A = (u + u.T > 1.6).astype(jnp.float32)
    A = jnp.maximum(A, jnp.eye(N, dtype=jnp.float32))
    d_inv_sqrt = 1.0 / jnp.sqrt(A.sum(axis=1))
    Adj = A * d_inv_sqrt[:, None] * d_inv_sqrt[None, :]

    W1 = 0.1 * jax.random.normal(kw1, (F_IN, H1), dtype=jnp.float32)
    b1 = 0.1 * jax.random.normal(kb1, (H1,), dtype=jnp.float32)
    W2 = 0.1 * jax.random.normal(kw2, (H1, H2), dtype=jnp.float32)
    b2 = 0.1 * jax.random.normal(kb2, (H2,), dtype=jnp.float32)

    # plain-JAX reference
    def leaky(x):
        return jnp.where(x >= 0, x, 0.2 * x)

    ref = leaky(Adj @ leaky(Adj @ (X @ W1) + b1) @ W2 + b2)

    # f32 MXU inputs (default): tight tolerance vs. the f32 reference.
    Z = jax.block_until_ready(encoder_forward(X, Adj, W1, b1, W2, b2))
    assert Z.shape == (N, H2)
    assert jnp.allclose(Z, ref, atol=5e-3, rtol=5e-3), float(jnp.abs(Z - ref).max())

    # bf16 MXU inputs with f32 accumulation: perf path for v6e / v7x MXU peak.
    Z_bf16 = jax.block_until_ready(
        encoder_forward(X, Adj, W1, b1, W2, b2, mxu_dtype=jnp.bfloat16))
    assert Z_bf16.shape == (N, H2)
    assert jnp.allclose(Z_bf16, ref, atol=5e-2, rtol=5e-2), \
        float(jnp.abs(Z_bf16 - ref).max())

    print("KERNEL_OK")
</pallas_src>

<mosaic_0001>
module attributes {stable_mosaic.version = 11 : i64} {
  func.func @_gcn_layer_kernel(%arg0: i32, %arg1: i32, %arg2: i32, %arg3: memref<128x256xf32, #tpu.memory_space<vmem>>, %arg4: memref<256x128xf32, #tpu.memory_space<vmem>>, %arg5: memref<128x128xf32, #tpu.memory_space<vmem>>, %arg6: memref<1x128xf32, #tpu.memory_space<vmem>>, %arg7: memref<128x128xf32, #tpu.memory_space<vmem>>) attributes {dimension_semantics = [#tpu.dimension_semantics<parallel>, #tpu.dimension_semantics<parallel>, #tpu.dimension_semantics<arbitrary>], iteration_bounds = array<i64: 2, 1, 1>, scalar_prefetch = 0 : i64, scratch_operands = 0 : i64, tpu.core_type = #tpu.core_type<tc>, window_params = [{transform_indices = @transform_0, window_bounds = array<i64: 128, 256>}, {transform_indices = @transform_1, window_bounds = array<i64: 256, 128>}, {transform_indices = @transform_2, window_bounds = array<i64: 128, 128>}, {transform_indices = @transform_3, window_bounds = array<i64: 1, 128>}, {transform_indices = @transform_4, window_bounds = array<i64: 128, 128>}]} {
    %c0_i32 = arith.constant 0 : i32
    %0 = arith.cmpi eq, %arg2, %c0_i32 : i32
    %1 = arith.extui %0 : i1 to i32
    %c0_i32_0 = arith.constant 0 : i32
    %2 = arith.cmpi ne, %1, %c0_i32_0 : i32
    scf.if %2 {
      %cst_13 = arith.constant 0.000000e+00 : f32
      %14 = vector.broadcast %cst_13 : f32 to vector<128x128xf32>
      %c0_14 = arith.constant 0 : index
      %c0_15 = arith.constant 0 : index
      %15 = vector.load %arg7[%c0_14, %c0_15] : memref<128x128xf32, #tpu.memory_space<vmem>>, vector<128x128xf32>
      tpu.vector_store %arg7[%c0_14, %c0_15], %14 {strides = array<i32>} : memref<128x128xf32, #tpu.memory_space<vmem>>, vector<128x128xf32>,
    } else {
    }
    %c0 = arith.constant 0 : index
    %c0_1 = arith.constant 0 : index
    %3 = vector.load %arg4[%c0, %c0_1] : memref<256x128xf32, #tpu.memory_space<vmem>>, vector<256x128xf32>
    %c0_2 = arith.constant 0 : index
    %c0_3 = arith.constant 0 : index
    %4 = vector.load %arg5[%c0_2, %c0_3] : memref<128x128xf32, #tpu.memory_space<vmem>>, vector<128x128xf32>
    %cst = arith.constant dense<0.000000e+00> : vector<256x128xf32>
    %5 = tpu.matmul %3, %4, %cst {dimension_numbers = #tpu.dot_dimension_numbers<[1], [0], [0], [1], [0, 0, 1, 1], [], []>} : vector<256x128xf32>, vector<128x128xf32>, vector<256x128xf32> -> vector<256x128xf32>
    %c0_4 = arith.constant 0 : index
    %c0_5 = arith.constant 0 : index
    %6 = vector.load %arg7[%c0_4, %c0_5] : memref<128x128xf32, #tpu.memory_space<vmem>>, vector<128x128xf32>
    %c0_6 = arith.constant 0 : index
    %c0_7 = arith.constant 0 : index
    %7 = vector.load %arg3[%c0_6, %c0_7] : memref<128x256xf32, #tpu.memory_space<vmem>>, vector<128x256xf32>
    %cst_8 = arith.constant dense<0.000000e+00> : vector<128x128xf32>
    %8 = tpu.matmul %7, %5, %cst_8 {dimension_numbers = #tpu.dot_dimension_numbers<[1], [0], [0], [1], [0, 0, 1, 1], [], []>} : vector<128x256xf32>, vector<256x128xf32>, vector<128x128xf32> -> vector<128x128xf32>
    %9 = arith.addf %6, %8 : vector<128x128xf32>
    %c0_9 = arith.constant 0 : index
    %c0_10 = arith.constant 0 : index
    %10 = vector.load %arg7[%c0_9, %c0_10] : memref<128x128xf32, #tpu.memory_space<vmem>>, vector<128x128xf32>
    tpu.vector_store %arg7[%c0_9, %c0_10], %9 {strides = array<i32>} : memref<128x128xf32, #tpu.memory_space<vmem>>, vector<128x128xf32>,
    %c0_i32_11 = arith.constant 0 : i32
    %11 = arith.cmpi eq, %arg2, %c0_i32_11 : i32
    %12 = arith.extui %11 : i1 to i32
    %c0_i32_12 = arith.constant 0 : i32
    %13 = arith.cmpi ne, %12, %c0_i32_12 : i32
    scf.if %13 {
      %c0_13 = arith.constant 0 : index
      %c0_14 = arith.constant 0 : index
      %14 = vector.load %arg7[%c0_13, %c0_14] : memref<128x128xf32, #tpu.memory_space<vmem>>, vector<128x128xf32>
      %c0_15 = arith.constant 0 : index
      %c0_16 = arith.constant 0 : index
      %15 = vector.load %arg6[%c0_15, %c0_16] : memref<1x128xf32, #tpu.memory_space<vmem>>, vector<1x128xf32>
      %16 = vector.broadcast %15 : vector<1x128xf32> to vector<128x128xf32>
      %17 = arith.addf %14, %16 : vector<128x128xf32>
      %cst_17 = arith.constant 0.000000e+00 : f32
      %18 = vector.broadcast %cst_17 : f32 to vector<128x128xf32>
      %19 = arith.cmpf oge, %17, %18 : vector<128x128xf32>
      %cst_18 = arith.constant 2.000000e-01 : f32
      %20 = vector.broadcast %cst_18 : f32 to vector<128x128xf32>
      %21 = arith.mulf %20, %17 : vector<128x128xf32>
      %22 = arith.select %19, %17, %21 : vector<128x128xi1>, vector<128x128xf32>
      %c0_19 = arith.constant 0 : index
      %c0_20 = arith.constant 0 : index
      %23 = vector.load %arg7[%c0_19, %c0_20] : memref<128x128xf32, #tpu.memory_space<vmem>>, vector<128x128xf32>
      tpu.vector_store %arg7[%c0_19, %c0_20], %22 {strides = array<i32>} : memref<128x128xf32, #tpu.memory_space<vmem>>, vector<128x128xf32>,
    } else {
    }
    return
  }
  func.func @transform_0(%arg0: i32, %arg1: i32, %arg2: i32) -> (i32, i32) {
    %c0_i32 = arith.constant 0 : i32
    return %arg0, %arg2 : i32, i32
  }
  func.func @transform_1(%arg0: i32, %arg1: i32, %arg2: i32) -> (i32, i32) {
    %c0_i32 = arith.constant 0 : i32
    %c0_i32_0 = arith.constant 0 : i32
    return %arg2, %c0_i32 : i32, i32
  }
  func.func @transform_2(%arg0: i32, %arg1: i32, %arg2: i32) -> (i32, i32) {
    %c0_i32 = arith.constant 0 : i32
    %c0_i32_0 = arith.constant 0 : i32
    return %c0_i32, %arg1 : i32, i32
  }
  func.func @transform_3(%arg0: i32, %arg1: i32, %arg2: i32) -> (i32, i32) {
    %c0_i32 = arith.constant 0 : i32
    %c0_i32_0 = arith.constant 0 : i32
    return %c0_i32, %arg1 : i32, i32
  }
  func.func @transform_4(%arg0: i32, %arg1: i32, %arg2: i32) -> (i32, i32) {
    %c0_i32 = arith.constant 0 : i32
    return %arg0, %arg1 : i32, i32
  }
}

</mosaic_0001>

<bundles_post_ra>
// kernel: tpu_custom_call.1
= control target key start
LH: loop header
LB: loop body
LE: loop exit
PB: predicated region body
PF: predicated region fallthrough
CT: control target
= control target key end

     0   :  { %s1519_s0 = inlined_call_operand.hbm [shape: f32[256,256], index: 0, kind: input, shape index: {}]   ;;  %s1520_s1 = inlined_call_operand.hbm [shape: f32[256,128], index: 1, kind: input, shape index: {}]   ;;  %s1521_s2 = inlined_call_operand.hbm [shape: f32[128,128], index: 2, kind: input, shape index: {}]   ;;  %s1522_s3 = inlined_call_operand.vmem [shape: f32[1,128], index: 3, kind: input, shape index: {}]   ;;  %s1523_s4 = inlined_call_operand.hbm [shape: f32[256,128], index: 4, kind: output, shape index: {}]  }
   0x1   :  { %1524 = sst [smem:[#allocation12_spill]] %s1520_s1 }
   0x2   :  { %1525 = sst [smem:[#allocation13_spill]] %s1521_s2 }
   0x3   :  { %9 = vsyncpa [#allocation3], 0 }
   0x4   :  { %11 = vsyncpa [#allocation3 + $0x1], 0 }
   0x5   :  { %12 = vsyncpa [#allocation6], 0 }
   0x6   :  { %13 = vsyncpa [#allocation4], 0 }
   0x7   :  { %15 = vsyncpa [#allocation4 + $0x1], 0  ;;  %s1287_s15 = smov 0   ;;  %s1289_s16 = smov 0  }
   0x8   :  { %s1291_s17 = smov 0   ;;  %s1293_s18 = smov 0  }
   0x9   :  { %s1295_s19 = smov 0   ;;  %s1297_s20 = smov 0  }
   0xa LB: > { %s945_s21 = sadd.s32 4294967295, %s1252_s20   ;;  %s946_s22 = sadd.s32 4294967294, %s1252_s20   ;;  %s1252_s20 = sphi %s1297_s20, %s21_s20   ;;  %s1248_s19 = sphi %s1295_s19, %s1539_s19   ;;  %s1244_s18 = sphi %s1293_s18, %s1538_s18   ;;  %s1240_s17 = sphi %s1291_s17, %s1537_s17   ;;  %s1236_s16 = sphi %s1289_s16, %s1536_s16   ;;  %s1232_s15 = sphi %s1287_s15, %s1535_s15  }
   0xb   : > { %p62_p0 = scmp.ne.s32.totalorder %s1236_s16, %s1232_s15  ;;  %p1321_p1 = scmp.eq.s32.totalorder %s945_s21, 0 }
   0xc   : > { %p1325_p2 = scmp.eq.s32.totalorder %s945_s21, 1  ;;  %p172_p3 = scmp.eq.s32.totalorder %s946_s22, 1 }
   0xd   : > { %p1331_p4 = por %p1321_p1, %p62_p0  ;;  %p947_p5 = scmp.ge.s32.totalorder %s1252_s20, 1 }
   0xe   : > { %p1336_p6 = por %p172_p3, %p62_p0  ;;  %p179_p7 = scmp.lt.s32.totalorder %s1252_s20, 3 }
   0xf   : > { %s1530_s1 = sld [smem:[#allocation12_spill]]  ;;  %s1254_s5 = smov [#allocation5]  }
  0x10   : > { %p1344_p8 = pnand %p947_p5, %p179_p7  ;;  %s195_s6 = sshll.u32 %s1254_s5, 4  ;;  %s196_s6 = int_to_ptr.vmem [resolvable:$true] %s195_s6 }
  0x11   : > { %p951_p11 = scmp.ge.s32.totalorder %s1252_s20, 2  ;;  %s1532_s2 = sld [smem:[#allocation13_spill]] }
  0x12   : > { %p997_p9 = pneg %p1344_p8  ;;  %s1255_s10 = smov 128  }
  0x13   : > { %s1256_s11 = smov 8   ;;  %s1257_s12 = smov [#allocation7]  }
  0x14   : > { %p998_p10 = pnand %p997_p9, %p1321_p1  ;;  %s211_s13 = sshll.u32 %s1257_s12, 4  ;;  %s212_s13 = int_to_ptr.vmem [resolvable:$true] %s211_s13 }
  0x15   : > { %s193_s29 = sshll.u32 %s1530_s1, 4  ;;  %s40_s14 = sadd.s32 1, %s1248_s19  ;;  %s194_s29 = int_to_ptr.hbm [resolvable:$true] %s193_s29 }
  0x16   : > { %1000 = dma.hbm_to_vmem [thread:$0]  (!%p998_p10), %s194_s29, 4096, %s196_s6, [#allocation6], %s1255_s10, %s1255_s10, %s1256_s11  }
  0x17   : > { %s209_s9 = sshll.u32 %s1532_s2, 4  ;;  %s49_s21 = sadd.s32 1, %s1240_s17  ;;  %s210_s9 = int_to_ptr.hbm [resolvable:$true] %s209_s9 }
  0x18   : > { %1003 = dma.hbm_to_vmem [thread:$0]  (!%p998_p10), %s210_s9, 2048, %s212_s13, [#allocation6], %s1255_s10, %s1255_s10, %s1256_s11  }
  0x19   : > { %p42_p12 = scmp.ge.s32.totalorder %s40_s14, 2  ;;  %p56_p13 = scmp.ne.s32.totalorder %s1240_s17, %s1236_s16 }
  0x1a   : > { %p57_p0 = scmp.eq.s32.totalorder %s1252_s20, 0  ;;  %p1014_p3 = scmp.lt.s32.totalorder %s1252_s20, 2 }
  0x1b   : > { %s1541_s14 = smov (%p42_p12, %s40_s14), 0  ;;  %p1370_p7 = por %p1325_p2, %p56_p13 }
  0x1c   : > { %p1364_p5 = por %p57_p0, %p56_p13  ;;  %s44_s28 = ssub.s32 %s1248_s19, %s1541_s14 }
  0x1d   : > { %s231_s29 = sand.u32 1, %s1240_s17   ;;  %p47_p9 = scmp.eq.s32.totalorder %s44_s28, 0 }
  0x1e   : > { %s952_s5 = sshll.u32 %s231_s29, 8  ;;  %s967_s6 = sshll.u32 %s1248_s19, 8 }
  0x1f   : > { %s1379_s7 = scalar_select %p47_p9, %s1240_s17, %s49_s21  }
  0x20   : > { %s243_s10 = scalar_lea.hbm %s1519_s0, %s967_s6  ;;  %s235_s12 = scalar_lea.vmem [#allocation2], %s952_s5 }
  0x21   : > { %s244_s11 = sshll.u32 %s243_s10, 4  ;;  %s246_s13 = sshll.u32 %s235_s12, 4  ;;  %s245_s11 = int_to_ptr.hbm [resolvable:$true] %s244_s11  ;;  %s247_s13 = int_to_ptr.vmem [resolvable:$true] %s246_s13 }
  0x22   : > { %p1005_p2 = pnand %p1014_p3, %p1364_p5  ;;  %s232_s24 = scalar_lea.sflag [#allocation3], %s231_s29 }
  0x23   : > { %s1258_s1 = smov 256   ;;  %s1259_s2 = smov 16  }
  0x24   : > { %1007 = dma.hbm_to_vmem [thread:$0]  (!%p1005_p2), %s245_s11, 4096, %s247_s13, %s232_s24, %s1258_s1, %s1258_s1, %s1259_s2  }
  0x25   : > { %258 = sbr.rel (%p1344_p8) target bundleno = 623 (0x26f), region = 36  ;;  %s1391_s21 = sand.u32 (!%p1344_p8), 1, %s1236_s16  }
  0x26   : > { %s957_s28 = sshll.u32 (!%p1344_p8), %s1391_s21, 8  ;;  %s261_s5 = scalar_lea.sflag (!%p1344_p8), [#allocation3], %s1391_s21 }
  0x27   : > { %s1395_s6 = scalar_lea.vmem (!%p1344_p8), [#allocation2], %s957_s28 }
  0x2a   : > { %1219 = dma.done.wait (%p1331_p4), %s261_s5, 4096  }
  0x2b   : > { %1221 = vsyncadd (%p1331_p4), %s261_s5, 4294963200 }
  0x2c   : > { %1223 = dma.done.wait (%p1321_p1), [#allocation6], 6144  }
  0x2d   : > { %1225 = vsyncadd (%p1321_p1), [#allocation6], 4294961152  ;;  %v377_v0 = vld [vmem:[#allocation7 + $0x78] sm:$0xff]  ;;  %v376_v1 = vld [vmem:[#allocation7 + $0x70] sm:$0xff]  ;;  %s960_s23 = sshll.u32 %s1391_s21, 7  ;;  %s968_s30 = sshll.u32 %s1244_s18, 7 }
  0x2e   : > { %378 = vmatpush.msra.mxu0 %v377_v0  ;;  %969 = vmatpush.msra.mxu3 %v377_v0  ;;  %v375_v2 = vld [vmem:[#allocation7 + $0x68] sm:$0xff]  ;;  %v374_v3 = vld [vmem:[#allocation7 + $0x60] sm:$0xff]  ;;  %v373_v4 = vld [vmem:[#allocation7 + $0x58] sm:$0xff]  ;;  %s1447_s25 = scalar_lea.vmem [#allocation8], %s960_s23  ;;  %s817_s8 = scalar_lea.hbm %s1523_s4, %s968_s30 }
  0x2f   : > { %v372_v5 = vld [vmem:[#allocation7 + $0x50] sm:$0xff]  ;;  %v371_v6 = vld [vmem:[#allocation7 + $0x48] sm:$0xff]  ;;  %v370_v7 = vld [vmem:[#allocation7 + $0x40] sm:$0xff]  ;;  %s818_s9 = sshll.u32 %s1447_s25, 4  ;;  %s820_s10 = sshll.u32 %s817_s8, 4  ;;  %s819_s9 = int_to_ptr.vmem [resolvable:$true] %s818_s9  ;;  %s821_s10 = int_to_ptr.hbm [resolvable:$true] %s820_s10 }
  0x30   : > { %379 = vmatpush.msra.mxu0 %v376_v1  ;;  %970 = vmatpush.msra.mxu3 %v376_v1  ;;  %v369_v8 = vld [vmem:[#allocation7 + $0x38] sm:$0xff]  ;;  %v368_v9 = vld [vmem:[#allocation7 + $0x30] sm:$0xff]  ;;  %v367_v10 = vld [vmem:[#allocation7 + $0x28] sm:$0xff]  ;;  %s805_s18 = scalar_lea.sflag [#allocation4], %s1391_s21  ;;  %s1180_s11 = sshra.s32 %s821_s10, 4  ;;  %s1181_s11 = int_to_ptr.hbm [resolvable:$true] %s1180_s11 }
  0x31   : > { %v366_v11 = vld [vmem:[#allocation7 + $0x20] sm:$0xff]  ;;  %v365_v12 = vld [vmem:[#allocation7 + $0x18] sm:$0xff]  ;;  %v364_v13 = vld [vmem:[#allocation7 + $0x10] sm:$0xff]  ;;  %s1182_s12 = scalar_lea.hbm %s1181_s11, 128  ;;  %s1186_s28 = scalar_lea.hbm %s1523_s4, 256 }
  0x32   : > { %380 = vmatpush.msra.mxu0 %v375_v2  ;;  %971 = vmatpush.msra.mxu3 %v375_v2  ;;  %v363_v14 = vld [vmem:[#allocation7 + $0x8] sm:$0xff]  ;;  %v362_v15 = vld [vmem:[#allocation7] sm:$0xff]  ;;  %v332_v20 = vld [vmem:[#allocation5 + $0x10] sm:$0xff]  ;;  %p1183_p1 = scmp.ne.s32.totalorder %s1181_s11, %s1182_s12  ;;  %p1187_p10 = scmp.lt.s32.totalorder %s1181_s11, %s1523_s4 }
  0x33   : > { %v330_v16 = vld [vmem:[#allocation5] sm:$0xff]  ;;  %v331_v18 = vld [vmem:[#allocation5 + $0x8] sm:$0xff]  ;;  %v348_v21 = vld [vmem:[#allocation5 + $0x90] sm:$0xff]  ;;  %p1188_p12 = scmp.lt.s32.totalorder %s1186_s28, %s1182_s12 }
  0x34   : > { %381 = vmatpush.msra.mxu0 %v374_v3  ;;  %972 = vmatpush.msra.mxu3 %v374_v3  ;;  %v346_v17 = vld [vmem:[#allocation5 + $0x80] sm:$0xff]  ;;  %v347_v19 = vld [vmem:[#allocation5 + $0x88] sm:$0xff]  ;;  %v333_v22 = vld [vmem:[#allocation5 + $0x18] sm:$0xff]  ;;  %p1184_p4 = pnand %p1183_p1, %p1370_p7 }
  0x35   : > { %v349_v23 = vld [vmem:[#allocation5 + $0x98] sm:$0xff]  ;;  %v334_v24 = vld [vmem:[#allocation5 + $0x20] sm:$0xff]  ;;  %v335_v26 = vld [vmem:[#allocation5 + $0x28] sm:$0xff]  ;;  %p1189_p13 = por %p1188_p12, %p1187_p10 }
  0x36   : > { %382 = vmatpush.msra.mxu0 %v373_v4  ;;  %973 = vmatpush.msra.mxu3 %v373_v4  ;;  %v350_v25 = vld [vmem:[#allocation5 + $0xa0] sm:$0xff]  ;;  %v351_v27 = vld [vmem:[#allocation5 + $0xa8] sm:$0xff]  ;;  %v336_v28 = vld [vmem:[#allocation5 + $0x30] sm:$0xff]  ;;  %p1185_p8 = pneg %p1184_p4 }
  0x37   : > { %v352_v29 = vld [vmem:[#allocation5 + $0xb0] sm:$0xff]  ;;  %v337_v30 = vld [vmem:[#allocation5 + $0x38] sm:$0xff]  ;;  %v338_v32 = vld [vmem:[#allocation5 + $0x40] sm:$0xff] }
  0x38   : > { %383 = vmatpush.msra.mxu0 %v372_v5  ;;  %974 = vmatpush.msra.mxu3 %v372_v5  ;;  %v353_v31 = vld [vmem:[#allocation5 + $0xb8] sm:$0xff]  ;;  %v354_v33 = vld [vmem:[#allocation5 + $0xc0] sm:$0xff]  ;;  %v339_v34 = vld [vmem:[#allocation5 + $0x48] sm:$0xff]  ;;  %p1190_p0 = pnand %p1189_p13, %p1185_p8 }
  0x39   : > { %v355_v35 = vld [vmem:[#allocation5 + $0xc8] sm:$0xff]  ;;  %v340_v36 = vld [vmem:[#allocation5 + $0x50] sm:$0xff]  ;;  %v341_v38 = vld [vmem:[#allocation5 + $0x58] sm:$0xff] }
  0x3a   : > { %384 = vmatpush.msra.mxu0 %v371_v6  ;;  %975 = vmatpush.msra.mxu3 %v371_v6  ;;  %v356_v37 = vld [vmem:[#allocation5 + $0xd0] sm:$0xff]  ;;  %v357_v39 = vld [vmem:[#allocation5 + $0xd8] sm:$0xff]  ;;  %v342_v40 = vld [vmem:[#allocation5 + $0x60] sm:$0xff] }
  0x3b   : > { %v358_v41 = vld [vmem:[#allocation5 + $0xe0] sm:$0xff]  ;;  %v343_v42 = vld [vmem:[#allocation5 + $0x68] sm:$0xff]  ;;  %v344_v44 = vld [vmem:[#allocation5 + $0x70] sm:$0xff] }
  0x3c   : > { %385 = vmatpush.msra.mxu0 %v370_v7  ;;  %976 = vmatpush.msra.mxu3 %v370_v7  ;;  %v359_v43 = vld [vmem:[#allocation5 + $0xe8] sm:$0xff]  ;;  %v360_v45 = vld [vmem:[#allocation5 + $0xf0] sm:$0xff]  ;;  %v345_v46 = vld [vmem:[#allocation5 + $0x78] sm:$0xff] }
  0x3d   : > { %v361_v47 = vld [vmem:[#allocation5 + $0xf8] sm:$0xff] }
  0x3e   : > { %386 = vmatpush.msra.mxu0 %v369_v8  ;;  %977 = vmatpush.msra.mxu3 %v369_v8 }
  0x40   : > { %387 = vmatpush.msra.mxu0 %v368_v9  ;;  %978 = vmatpush.msra.mxu3 %v368_v9 }
  0x42   : > { %388 = vmatpush.msra.mxu0 %v367_v10  ;;  %979 = vmatpush.msra.mxu3 %v367_v10 }
  0x44   : > { %389 = vmatpush.msra.mxu0 %v366_v11  ;;  %980 = vmatpush.msra.mxu3 %v366_v11 }
  0x46   : > { %390 = vmatpush.msra.mxu0 %v365_v12  ;;  %981 = vmatpush.msra.mxu3 %v365_v12 }
  0x48   : > { %391 = vmatpush.msra.mxu0 %v364_v13  ;;  %982 = vmatpush.msra.mxu3 %v364_v13 }
  0x4a   : > { %392 = vmatpush.msra.mxu0 %v363_v14  ;;  %983 = vmatpush.msra.mxu3 %v363_v14 }
  0x4c   : > { %393 = vmatpush.msra.mxu0 %v362_v15  ;;  %984 = vmatpush.msra.mxu3 %v362_v15 }
  0x4d   : > { %394 = vmatmul.f32.vlgmr.msra.gmra.mxu0 %v330_v16  ;;  %442 = vmatmul.f32.vlgmr.msra.gmra.mxu3 %v346_v17  ;;  %v507_v16 = vld [vmem:[%s1395_s6] sm:$0xff]  ;;  %v508_v17 = vld [vmem:[%s1395_s6 + $0x8] sm:$0xff] }
  0x55   : > { %397 = vmatmul.f32.gmra.mxu0 %v331_v18  ;;  %445 = vmatmul.f32.gmra.mxu3 %v347_v19  ;;  %v509_v18 = vld [vmem:[%s1395_s6 + $0x10] sm:$0xff]  ;;  %v510_v19 = vld [vmem:[%s1395_s6 + $0x18] sm:$0xff] }
  0x5d   : > { %400 = vmatmul.f32.gmra.mxu0 %v332_v20  ;;  %448 = vmatmul.f32.gmra.mxu3 %v348_v21  ;;  %v511_v20 = vld [vmem:[%s1395_s6 + $0x20] sm:$0xff]  ;;  %v512_v21 = vld [vmem:[%s1395_s6 + $0x28] sm:$0xff] }
  0x65   : > { %403 = vmatmul.f32.gmra.mxu0 %v333_v22  ;;  %451 = vmatmul.f32.gmra.mxu3 %v349_v23  ;;  %v513_v22 = vld [vmem:[%s1395_s6 + $0x30] sm:$0xff]  ;;  %v514_v23 = vld [vmem:[%s1395_s6 + $0x38] sm:$0xff] }
  0x6d   : > { %406 = vmatmul.f32.gmra.mxu0 %v334_v24  ;;  %454 = vmatmul.f32.gmra.mxu3 %v350_v25  ;;  %v515_v24 = vld [vmem:[%s1395_s6 + $0x40] sm:$0xff]  ;;  %v516_v25 = vld [vmem:[%s1395_s6 + $0x48] sm:$0xff] }
  0x75   : > { %409 = vmatmul.f32.gmra.mxu0 %v335_v26  ;;  %457 = vmatmul.f32.gmra.mxu3 %v351_v27  ;;  %v517_v26 = vld [vmem:[%s1395_s6 + $0x50] sm:$0xff]  ;;  %v518_v27 = vld [vmem:[%s1395_s6 + $0x58] sm:$0xff] }
  0x7d   : > { %412 = vmatmul.f32.gmra.mxu0 %v336_v28  ;;  %460 = vmatmul.f32.gmra.mxu3 %v352_v29  ;;  %v519_v28 = vld [vmem:[%s1395_s6 + $0x60] sm:$0xff]  ;;  %v520_v29 = vld [vmem:[%s1395_s6 + $0x68] sm:$0xff] }
  0x85   : > { %415 = vmatmul.f32.gmra.mxu0 %v337_v30  ;;  %463 = vmatmul.f32.gmra.mxu3 %v353_v31  ;;  %v521_v30 = vld [vmem:[%s1395_s6 + $0x70] sm:$0xff]  ;;  %v522_v31 = vld [vmem:[%s1395_s6 + $0x78] sm:$0xff] }
  0x8d   : > { %418 = vmatmul.f32.gmra.mxu0 %v338_v32  ;;  %466 = vmatmul.f32.gmra.mxu3 %v354_v33  ;;  %v523_v32 = vld [vmem:[%s1395_s6 + $0x80] sm:$0xff]  ;;  %v524_v33 = vld [vmem:[%s1395_s6 + $0x88] sm:$0xff] }
  0x95   : > { %421 = vmatmul.f32.gmra.mxu0 %v339_v34  ;;  %469 = vmatmul.f32.gmra.mxu3 %v355_v35  ;;  %v525_v34 = vld [vmem:[%s1395_s6 + $0x90] sm:$0xff]  ;;  %v526_v35 = vld [vmem:[%s1395_s6 + $0x98] sm:$0xff] }
  0x9d   : > { %424 = vmatmul.f32.gmra.mxu0 %v340_v36  ;;  %472 = vmatmul.f32.gmra.mxu3 %v356_v37  ;;  %v527_v36 = vld [vmem:[%s1395_s6 + $0xa0] sm:$0xff]  ;;  %v528_v37 = vld [vmem:[%s1395_s6 + $0xa8] sm:$0xff] }
  0xa5   : > { %427 = vmatmul.f32.gmra.mxu0 %v341_v38  ;;  %475 = vmatmul.f32.gmra.mxu3 %v357_v39  ;;  %v529_v38 = vld [vmem:[%s1395_s6 + $0xb0] sm:$0xff]  ;;  %v530_v39 = vld [vmem:[%s1395_s6 + $0xb8] sm:$0xff] }
  0xad   : > { %430 = vmatmul.f32.gmra.mxu0 %v342_v40  ;;  %478 = vmatmul.f32.gmra.mxu3 %v358_v41  ;;  %v531_v40 = vld [vmem:[%s1395_s6 + $0xc0] sm:$0xff]  ;;  %v532_v41 = vld [vmem:[%s1395_s6 + $0xc8] sm:$0xff] }
  0xb5   : > { %433 = vmatmul.f32.gmra.mxu0 %v343_v42  ;;  %481 = vmatmul.f32.gmra.mxu3 %v359_v43  ;;  %v533_v42 = vld [vmem:[%s1395_s6 + $0xd0] sm:$0xff]  ;;  %v534_v43 = vld [vmem:[%s1395_s6 + $0xd8] sm:$0xff] }
  0xbd   : > { %436 = vmatmul.f32.gmra.mxu0 %v344_v44  ;;  %484 = vmatmul.f32.gmra.mxu3 %v360_v45  ;;  %v535_v44 = vld [vmem:[%s1395_s6 + $0xe0] sm:$0xff]  ;;  %v536_v45 = vld [vmem:[%s1395_s6 + $0xe8] sm:$0xff] }
  0xc5   : > { %439 = vmatmul.f32.gmra.mxu0 %v345_v46  ;;  %487 = vmatmul.f32.gmra.mxu3 %v361_v47  ;;  %v537_v46 = vld [vmem:[%s1395_s6 + $0xf0] sm:$0xff]  ;;  %v538_v47 = vld [vmem:[%s1395_s6 + $0xf8] sm:$0xff] }
  0xca   : > { %v395_v48 = vpop.f32.mrf.mxu0 }
  0xd0   : > { %v1405_v49 = vpop.f32.mrf.mxu3 }
  0xd2   : > { %v398_v50 = vpop.f32.mrf.mxu0 }
  0xd8   : > { %v446_v51 = vpop.f32.mrf.mxu3 }
  0xda   : > { %v401_v52 = vpop.f32.mrf.mxu0 }
  0xe0   : > { %v449_v53 = vpop.f32.mrf.mxu3 }
  0xe2   : > { %v404_v54 = vpop.f32.mrf.mxu0 }
  0xe8   : > { %v452_v55 = vpop.f32.mrf.mxu3 }
  0xea   : > { %v407_v56 = vpop.f32.mrf.mxu0 }
  0xf0   : > { %v455_v57 = vpop.f32.mrf.mxu3 }
  0xf2   : > { %v410_v58 = vpop.f32.mrf.mxu0 }
  0xf8   : > { %v458_v59 = vpop.f32.mrf.mxu3 }
  0xfa   : > { %v413_v60 = vpop.f32.mrf.mxu0 }
 0x100   : > { %v461_v61 = vpop.f32.mrf.mxu3 }
 0x102   : > { %v416_v62 = vpop.f32.mrf.mxu0 }
 0x108   : > { %v464_v63 = vpop.f32.mrf.mxu3 }
 0x10a   : > { %v419_v0 = vpop.f32.mrf.mxu0 }
 0x110   : > { %v467_v1 = vpop.f32.mrf.mxu3 }
 0x112   : > { %v422_v2 = vpop.f32.mrf.mxu0 }
 0x118   : > { %v470_v3 = vpop.f32.mrf.mxu3 }
 0x11a   : > { %v425_v4 = vpop.f32.mrf.mxu0 }
 0x120   : > { %v473_v5 = vpop.f32.mrf.mxu3 }
 0x122   : > { %v428_v6 = vpop.f32.mrf.mxu0 }
 0x128   : > { %v476_v7 = vpop.f32.mrf.mxu3 }
 0x12a   : > { %v431_v8 = vpop.f32.mrf.mxu0 }
 0x130   : > { %v479_v9 = vpop.f32.mrf.mxu3 }
 0x132   : > { %v434_v10 = vpop.f32.mrf.mxu0 }
 0x138   : > { %v482_v11 = vpop.f32.mrf.mxu3 }
 0x13a   : > { %v437_v12 = vpop.f32.mrf.mxu0 }
 0x140   : > { %v485_v13 = vpop.f32.mrf.mxu3 }
 0x142   : > { %v440_v14 = vpop.f32.mrf.mxu0 }
 0x143   : > { %539 = vmatpush.msra.mxu1 %v440_v14 }
 0x145   : > { %540 = vmatpush.msra.mxu1 %v437_v12 }
 0x147   : > { %541 = vmatpush.msra.mxu1 %v434_v10 }
 0x148   : > { %v488_v15 = vpop.f32.mrf.mxu3 }
 0x149   : > { %542 = vmatpush.msra.mxu1 %v431_v8  ;;  %604 = vmatpush.msra.mxu2 %v488_v15 }
 0x14b   : > { %543 = vmatpush.msra.mxu1 %v428_v6  ;;  %605 = vmatpush.msra.mxu2 %v485_v13 }
 0x14d   : > { %544 = vmatpush.msra.mxu1 %v425_v4  ;;  %606 = vmatpush.msra.mxu2 %v482_v11 }
 0x14f   : > { %545 = vmatpush.msra.mxu1 %v422_v2  ;;  %607 = vmatpush.msra.mxu2 %v479_v9 }
 0x151   : > { %546 = vmatpush.msra.mxu1 %v419_v0  ;;  %608 = vmatpush.msra.mxu2 %v476_v7 }
 0x153   : > { %547 = vmatpush.msra.mxu1 %v416_v62  ;;  %609 = vmatpush.msra.mxu2 %v473_v5 }
 0x155   : > { %548 = vmatpush.msra.mxu1 %v413_v60  ;;  %610 = vmatpush.msra.mxu2 %v470_v3 }
 0x157   : > { %549 = vmatpush.msra.mxu1 %v410_v58  ;;  %611 = vmatpush.msra.mxu2 %v467_v1 }
 0x159   : > { %550 = vmatpush.msra.mxu1 %v407_v56  ;;  %612 = vmatpush.msra.mxu2 %v464_v63 }
 0x15b   : > { %551 = vmatpush.msra.mxu1 %v404_v54  ;;  %613 = vmatpush.msra.mxu2 %v461_v61 }
 0x15d   : > { %552 = vmatpush.msra.mxu1 %v401_v52  ;;  %614 = vmatpush.msra.mxu2 %v458_v59  ;;  %v1443_v52 = vld [vmem:[%s1522_s3] ss:$0 sm:$0xff] }
 0x15f   : > { %553 = vmatpush.msra.mxu1 %v398_v50  ;;  %615 = vmatpush.msra.mxu2 %v455_v57 }
 0x161   : > { %554 = vmatpush.msra.mxu1 %v395_v48  ;;  %616 = vmatpush.msra.mxu2 %v452_v55 }
 0x162   : > { %555 = vmatmul.f32.vlgmr.msra.gmra.mxu1 %v507_v16 }
 0x163   : > { %617 = vmatpush.msra.mxu2 %v449_v53 }
 0x165   : > { %618 = vmatpush.msra.mxu2 %v446_v51 }
 0x167   : > { %619 = vmatpush.msra.mxu2 %v1405_v49 }
 0x168   : > { %620 = vmatmul.f32.vlgmr.msra.gmra.mxu2 %v508_v17 }
 0x16a   : > { %558 = vmatmul.f32.gmra.mxu1 %v509_v18 }
 0x170   : > { %623 = vmatmul.f32.gmra.mxu2 %v510_v19 }
 0x172   : > { %561 = vmatmul.f32.gmra.mxu1 %v511_v20 }
 0x178   : > { %626 = vmatmul.f32.gmra.mxu2 %v512_v21 }
 0x17a   : > { %564 = vmatmul.f32.gmra.mxu1 %v513_v22 }
 0x180   : > { %629 = vmatmul.f32.gmra.mxu2 %v514_v23 }
 0x182   : > { %567 = vmatmul.f32.gmra.mxu1 %v515_v24 }
 0x188   : > { %632 = vmatmul.f32.gmra.mxu2 %v516_v25 }
 0x18a   : > { %570 = vmatmul.f32.gmra.mxu1 %v517_v26 }
 0x190   : > { %635 = vmatmul.f32.gmra.mxu2 %v518_v27 }
 0x192   : > { %573 = vmatmul.f32.gmra.mxu1 %v519_v28 }
 0x198   : > { %638 = vmatmul.f32.gmra.mxu2 %v520_v29 }
 0x19a   : > { %576 = vmatmul.f32.gmra.mxu1 %v521_v30 }
 0x1a0   : > { %641 = vmatmul.f32.gmra.mxu2 %v522_v31 }
 0x1a2   : > { %579 = vmatmul.f32.gmra.mxu1 %v523_v32 }
 0x1a8   : > { %644 = vmatmul.f32.gmra.mxu2 %v524_v33 }
 0x1aa   : > { %582 = vmatmul.f32.gmra.mxu1 %v525_v34 }
 0x1b0   : > { %647 = vmatmul.f32.gmra.mxu2 %v526_v35 }
 0x1b2   : > { %585 = vmatmul.f32.gmra.mxu1 %v527_v36 }
 0x1b8   : > { %650 = vmatmul.f32.gmra.mxu2 %v528_v37 }
 0x1ba   : > { %588 = vmatmul.f32.gmra.mxu1 %v529_v38 }
 0x1c0   : > { %653 = vmatmul.f32.gmra.mxu2 %v530_v39 }
 0x1c2   : > { %591 = vmatmul.f32.gmra.mxu1 %v531_v40 }
 0x1c8   : > { %656 = vmatmul.f32.gmra.mxu2 %v532_v41 }
 0x1ca   : > { %594 = vmatmul.f32.gmra.mxu1 %v533_v42 }
 0x1d0   : > { %659 = vmatmul.f32.gmra.mxu2 %v534_v43 }
 0x1d2   : > { %597 = vmatmul.f32.gmra.mxu1 %v535_v44 }
 0x1d8   : > { %662 = vmatmul.f32.gmra.mxu2 %v536_v45 }
 0x1da   : > { %600 = vmatmul.f32.gmra.mxu1 %v537_v46 }
 0x1df   : > { %v556_v48 = vpop.f32.mrf.mxu1 }
 0x1e0   : > { %665 = vmatmul.f32.gmra.mxu2 %v538_v47 }
 0x1e7   : > { %v559_v49 = vpop.f32.mrf.mxu1 }
 0x1eb   : > { %v621_v50 = vpop.f32.mrf.mxu2 }
 0x1ec   : > { %v622_v51 = vadd.f32 %v621_v50, %v556_v48 }
 0x1ee   : > { %v724_v54 = vadd.f32 %v1443_v52, %v622_v51 }
 0x1ef   : > { %v562_v53 = vpop.f32.mrf.mxu1 }
 0x1f0   : > { %vm740_vm0 = vcmp.ge.f32.partialorder %v724_v54, 0.0  ;;  %v756_v55 = vmul.f32 0.2, %v724_v54 }
 0x1f2   : > { %v772_v57 = vsel %vm740_vm0, %v724_v54, %v756_v55 }
 0x1f3   : > { %v624_v56 = vpop.f32.mrf.mxu2  ;;  %788 = vst [vmem:[%s1447_s25] sm:$0xff] %v772_v57 }
 0x1f4   : > { %v625_v58 = vadd.f32 %v624_v56, %v559_v49 }
 0x1f6   : > { %v725_v60 = vadd.f32 %v1443_v52, %v625_v58 }
 0x1f7   : > { %v565_v59 = vpop.f32.mrf.mxu1 }
 0x1f8   : > { %vm741_vm1 = vcmp.ge.f32.partialorder %v725_v60, 0.0  ;;  %v757_v61 = vmul.f32 0.2, %v725_v60 }
 0x1fa   : > { %v773_v63 = vsel %vm741_vm1, %v725_v60, %v757_v61 }
 0x1fb   : > { %v627_v62 = vpop.f32.mrf.mxu2  ;;  %789 = vst [vmem:[%s1447_s25 + $0x8] sm:$0xff] %v773_v63 }
 0x1fc   : > { %v628_v0 = vadd.f32 %v627_v62, %v562_v53 }
 0x1fe   : > { %v726_v2 = vadd.f32 %v1443_v52, %v628_v0 }
 0x1ff   : > { %v568_v1 = vpop.f32.mrf.mxu1 }
 0x200   : > { %vm742_vm2 = vcmp.ge.f32.partialorder %v726_v2, 0.0  ;;  %v758_v3 = vmul.f32 0.2, %v726_v2 }
 0x202   : > { %v774_v5 = vsel %vm742_vm2, %v726_v2, %v758_v3 }
 0x203   : > { %v630_v4 = vpop.f32.mrf.mxu2  ;;  %790 = vst [vmem:[%s1447_s25 + $0x10] sm:$0xff] %v774_v5 }
 0x204   : > { %v631_v6 = vadd.f32 %v630_v4, %v565_v59 }
 0x206   : > { %v727_v8 = vadd.f32 %v1443_v52, %v631_v6 }
 0x207   : > { %v571_v7 = vpop.f32.mrf.mxu1 }
 0x208   : > { %vm743_vm3 = vcmp.ge.f32.partialorder %v727_v8, 0.0  ;;  %v759_v9 = vmul.f32 0.2, %v727_v8 }
 0x20a   : > { %v775_v11 = vsel %vm743_vm3, %v727_v8, %v759_v9 }
 0x20b   : > { %v633_v10 = vpop.f32.mrf.mxu2  ;;  %791 = vst [vmem:[%s1447_s25 + $0x18] sm:$0xff] %v775_v11 }
 0x20c   : > { %v634_v12 = vadd.f32 %v633_v10, %v568_v1 }
 0x20e   : > { %v728_v14 = vadd.f32 %v1443_v52, %v634_v12 }
 0x20f   : > { %v574_v13 = vpop.f32.mrf.mxu1 }
 0x210   : > { %vm744_vm4 = vcmp.ge.f32.partialorder %v728_v14, 0.0  ;;  %v760_v15 = vmul.f32 0.2, %v728_v14 }
 0x212   : > { %v776_v17 = vsel %vm744_vm4, %v728_v14, %v760_v15 }
 0x213   : > { %v636_v16 = vpop.f32.mrf.mxu2  ;;  %792 = vst [vmem:[%s1447_s25 + $0x20] sm:$0xff] %v776_v17 }
 0x214   : > { %v637_v18 = vadd.f32 %v636_v16, %v571_v7 }
 0x216   : > { %v729_v20 = vadd.f32 %v1443_v52, %v637_v18 }
 0x217   : > { %v577_v19 = vpop.f32.mrf.mxu1 }
 0x218   : > { %vm745_vm5 = vcmp.ge.f32.partialorder %v729_v20, 0.0  ;;  %v761_v21 = vmul.f32 0.2, %v729_v20 }
 0x21a   : > { %v777_v23 = vsel %vm745_vm5, %v729_v20, %v761_v21 }
 0x21b   : > { %v639_v22 = vpop.f32.mrf.mxu2  ;;  %793 = vst [vmem:[%s1447_s25 + $0x28] sm:$0xff] %v777_v23 }
 0x21c   : > { %v640_v24 = vadd.f32 %v639_v22, %v574_v13 }
 0x21e   : > { %v730_v26 = vadd.f32 %v1443_v52, %v640_v24 }
 0x21f   : > { %v580_v25 = vpop.f32.mrf.mxu1 }
 0x220   : > { %vm746_vm6 = vcmp.ge.f32.partialorder %v730_v26, 0.0  ;;  %v762_v27 = vmul.f32 0.2, %v730_v26 }
 0x222   : > { %v778_v29 = vsel %vm746_vm6, %v730_v26, %v762_v27 }
 0x223   : > { %v642_v28 = vpop.f32.mrf.mxu2  ;;  %794 = vst [vmem:[%s1447_s25 + $0x30] sm:$0xff] %v778_v29 }
 0x224   : > { %v643_v30 = vadd.f32 %v642_v28, %v577_v19 }
 0x226   : > { %v731_v32 = vadd.f32 %v1443_v52, %v643_v30 }
 0x227   : > { %v583_v31 = vpop.f32.mrf.mxu1 }
 0x228   : > { %vm747_vm7 = vcmp.ge.f32.partialorder %v731_v32, 0.0  ;;  %v763_v33 = vmul.f32 0.2, %v731_v32 }
 0x22a   : > { %v779_v35 = vsel %vm747_vm7, %v731_v32, %v763_v33 }
 0x22b   : > { %v645_v34 = vpop.f32.mrf.mxu2  ;;  %795 = vst [vmem:[%s1447_s25 + $0x38] sm:$0xff] %v779_v35 }
 0x22c   : > { %v646_v36 = vadd.f32 %v645_v34, %v580_v25 }
 0x22e   : > { %v732_v38 = vadd.f32 %v1443_v52, %v646_v36 }
 0x22f   : > { %v586_v37 = vpop.f32.mrf.mxu1 }
 0x230   : > { %vm748_vm8 = vcmp.ge.f32.partialorder %v732_v38, 0.0  ;;  %v764_v39 = vmul.f32 0.2, %v732_v38 }
 0x232   : > { %v780_v41 = vsel %vm748_vm8, %v732_v38, %v764_v39 }
 0x233   : > { %v648_v40 = vpop.f32.mrf.mxu2  ;;  %796 = vst [vmem:[%s1447_s25 + $0x40] sm:$0xff] %v780_v41 }
 0x234   : > { %v649_v42 = vadd.f32 %v648_v40, %v583_v31 }
 0x236   : > { %v733_v43 = vadd.f32 %v1443_v52, %v649_v42 }
 0x237   : > { %v589_v44 = vpop.f32.mrf.mxu1 }
 0x238   : > { %vm749_vm9 = vcmp.ge.f32.partialorder %v733_v43, 0.0  ;;  %v765_v45 = vmul.f32 0.2, %v733_v43 }
 0x23a   : > { %v781_v47 = vsel %vm749_vm9, %v733_v43, %v765_v45 }
 0x23b   : > { %v651_v46 = vpop.f32.mrf.mxu2  ;;  %797 = vst [vmem:[%s1447_s25 + $0x48] sm:$0xff] %v781_v47 }
 0x23c   : > { %v652_v48 = vadd.f32 %v651_v46, %v586_v37 }
 0x23e   : > { %v734_v49 = vadd.f32 %v1443_v52, %v652_v48 }
 0x23f   : > { %v592_v53 = vpop.f32.mrf.mxu1 }
 0x240   : > { %vm750_vm10 = vcmp.ge.f32.partialorder %v734_v49, 0.0  ;;  %v766_v50 = vmul.f32 0.2, %v734_v49 }
 0x242   : > { %v782_v54 = vsel %vm750_vm10, %v734_v49, %v766_v50 }
 0x243   : > { %v654_v51 = vpop.f32.mrf.mxu2  ;;  %798 = vst [vmem:[%s1447_s25 + $0x50] sm:$0xff] %v782_v54 }
 0x244   : > { %v655_v55 = vadd.f32 %v654_v51, %v589_v44 }
 0x246   : > { %v735_v56 = vadd.f32 %v1443_v52, %v655_v55 }
 0x247   : > { %v595_v61 = vpop.f32.mrf.mxu1 }
 0x248   : > { %vm751_vm11 = vcmp.ge.f32.partialorder %v735_v56, 0.0  ;;  %v767_v57 = vmul.f32 0.2, %v735_v56 }
 0x24a   : > { %v783_v59 = vsel %vm751_vm11, %v735_v56, %v767_v57 }
 0x24b   : > { %v657_v58 = vpop.f32.mrf.mxu2  ;;  %799 = vst [vmem:[%s1447_s25 + $0x58] sm:$0xff] %v783_v59 }
 0x24c   : > { %v658_v60 = vadd.f32 %v657_v58, %v592_v53 }
 0x24e   : > { %v736_v62 = vadd.f32 %v1443_v52, %v658_v60 }
 0x24f   : > { %v598_v3 = vpop.f32.mrf.mxu1 }
 0x250   : > { %vm752_vm12 = vcmp.ge.f32.partialorder %v736_v62, 0.0  ;;  %v768_v63 = vmul.f32 0.2, %v736_v62 }
 0x252   : > { %v784_v1 = vsel %vm752_vm12, %v736_v62, %v768_v63 }
 0x253   : > { %v660_v0 = vpop.f32.mrf.mxu2  ;;  %800 = vst [vmem:[%s1447_s25 + $0x60] sm:$0xff] %v784_v1 }
 0x254   : > { %v661_v2 = vadd.f32 %v660_v0, %v595_v61 }
 0x256   : > { %v737_v4 = vadd.f32 %v1443_v52, %v661_v2 }
 0x257   : > { %v601_v10 = vpop.f32.mrf.mxu1 }
 0x258   : > { %vm753_vm13 = vcmp.ge.f32.partialorder %v737_v4, 0.0  ;;  %v769_v5 = vmul.f32 0.2, %v737_v4 }
 0x25a   : > { %v785_v7 = vsel %vm753_vm13, %v737_v4, %v769_v5 }
 0x25b   : > { %v663_v6 = vpop.f32.mrf.mxu2  ;;  %801 = vst [vmem:[%s1447_s25 + $0x68] sm:$0xff] %v785_v7 }
 0x25c   : > { %v664_v8 = vadd.f32 %v663_v6, %v598_v3 }
 0x25e   : > { %v738_v9 = vadd.f32 %v1443_v52, %v664_v8 }
 0x260   : > { %vm754_vm14 = vcmp.ge.f32.partialorder %v738_v9, 0.0  ;;  %v770_v11 = vmul.f32 0.2, %v738_v9 }
 0x262   : > { %v786_v13 = vsel %vm754_vm14, %v738_v9, %v770_v11 }
 0x263   : > { %v666_v12 = vpop.f32.mrf.mxu2  ;;  %802 = vst [vmem:[%s1447_s25 + $0x70] sm:$0xff] %v786_v13 }
 0x264   : > { %v667_v14 = vadd.f32 %v666_v12, %v601_v10 }
 0x266   : > { %v739_v15 = vadd.f32 %v1443_v52, %v667_v14 }
 0x268   : > { %vm755_vm15 = vcmp.ge.f32.partialorder %v739_v15, 0.0  ;;  %v771_v16 = vmul.f32 0.2, %v739_v15 }
 0x26a   : > { %v787_v17 = vsel %vm755_vm15, %v739_v15, %v771_v16 }
 0x26b   : > { %803 = vst [vmem:[%s1447_s25 + $0x78] sm:$0xff] %v787_v17 }
 0x26c   : > { %1193 = shalt.err (!%p1190_p0)
}
 0x26d   : > { %s1260_s21 = smov 128   ;;  %s1261_s1 = smov 8  }
 0x26e   : > { %995 = dma.vmem_to_hbm [thread:$0]  (%p1370_p7), %s819_s9, 2048, %s821_s10, %s805_s18, %s1260_s21, %s1260_s21, %s1261_s1  }
 0x26f PF: > { %s835_s2 = sand.u32 1, %s1232_s15   ;;  %p1009_p3 = pnand %p951_p11, %p1336_p6 }
 0x270   : > { %s836_s23 = scalar_lea.sflag [#allocation4], %s835_s2 }
 0x271   : > { %p1010_p5 = pneg %p1009_p3 }
 0x273   : > { %1227 = dma.done.wait (%p1010_p5), %s836_s23, 2048  }
 0x274   : > { %1229 = vsyncadd (%p1010_p5), %s836_s23, 4294965248  ;;  %s21_s20 = sadd.s32 1, %s1252_s20   ;;  %s1535_s15 = smov %s1236_s16 }
 0x275   : > { %p18_p9 = scmp.ge.s32.totalorder %s21_s20, 4   ;;  %s1536_s16 = smov %s1240_s17 }
 0x276   : > { %s1537_s17 = smov %s1379_s7  ;;  %s1538_s18 = smov %s1248_s19 }
 0x277   : > { %s1539_s19 = smov %s1541_s14  ;;  %20 = sbr.rel (!%p18_p9) target bundleno = 10 (0xa), region = 102 }
 0x27c   :  { %842 = vsyncpa [#allocation3], 1 }
 0x27d   :  { %844 = vsyncpa [#allocation3 + $0x1], 1 }
 0x27e   :  { %845 = vsyncpa [#allocation6], 1 }
 0x27f   :  { %846 = vsyncpa [#allocation4], 1 }
 0x280   :  { %848 = vsyncpa [#allocation4 + $0x1], 1 }

</bundles_post_ra>
